<compile_context>
chip_gen: v7x
topology: tpu7x:2x2x1
jax: 0.10.0
libtpu: 0.0.40
codegen_flags: <defaults>
</compile_context>

<pallas_src>
import jax
import jax.numpy as jnp
from jax import lax
from jax.experimental import pallas as pl
from jax.experimental.pallas import tpu as pltpu


def _clip_loss_kernel(t_ref, v1_ref, v2_ref, lab_ref, out_ref,
                      m_row, l_row, rcnt,          # per-row-block LSE state (reset each row sweep)
                      m_col, l_col, ccnt,          # per-column LSE state (persists across row blocks)
                      s_row, s_dot, s_cnt):        # scalar accumulators
    i = pl.program_id(0)            # row block of vectors1
    j = pl.program_id(1)            # column block (rows of vectors2)
    ni = pl.num_programs(0)
    nj = pl.num_programs(1)

    # ---------------- init accumulators ----------------
    @pl.when(jnp.logical_and(i == 0, j == 0))
    def _():
        s_row[...] = jnp.zeros_like(s_row)
        s_dot[...] = jnp.zeros_like(s_dot)
        s_cnt[...] = jnp.zeros_like(s_cnt)

    @pl.when(i == 0)
    def _():
        m_col[j] = jnp.full(m_col.shape[1:], -jnp.inf, jnp.float32)
        l_col[j] = jnp.zeros(l_col.shape[1:], jnp.float32)
        ccnt[j] = jnp.zeros(ccnt.shape[1:], jnp.float32)

    @pl.when(j == 0)
    def _():
        m_row[...] = jnp.full_like(m_row, -jnp.inf)
        l_row[...] = jnp.zeros_like(l_row)
        rcnt[...] = jnp.zeros_like(rcnt)

    # ---------------- block compute ----------------
    eps = 1e-12
    v1 = v1_ref[...].astype(jnp.float32)
    v2 = v2_ref[...].astype(jnp.float32)

    # F.normalize(x, dim=1, eps=1e-12) == x * rsqrt(max(sum(x^2), eps^2))
    v1n = v1 * lax.rsqrt(jnp.maximum(jnp.sum(v1 * v1, axis=1, keepdims=True), eps * eps))
    v2n = v2 * lax.rsqrt(jnp.maximum(jnp.sum(v2 * v2, axis=1, keepdims=True), eps * eps))

    scale = jnp.exp(t_ref[0, 0])
    # logits_block = v1n @ v2n.T : contract the feature dims directly (no transpose copy)
    logits = lax.dot_general(v1n, v2n, (((1,), (1,)), ((), ())),
                             preferred_element_type=jnp.float32) * scale

    maskf = (lab_ref[...].astype(jnp.float32) == 1.0).astype(jnp.float32)

    # Shared masked statistics (identical positive set for both CE terms).
    s_dot[...] += jnp.sum(maskf * logits)                       # sum of labelled logits
    s_cnt[...] += jnp.sum(maskf)                                # number of positives
    rcnt[...] += jnp.sum(maskf, axis=1, keepdims=True)          # positives per row
    ccnt[j] = ccnt[j] + jnp.sum(maskf, axis=0, keepdims=True)   # positives per column

    # One exp for the tile, referenced to the current block maxima so every
    # correction exponent is <= 0 (no overflow anywhere).
    blk_rmax = jnp.max(logits, axis=1, keepdims=True)           # (bn, 1) per-row block max
    g = jnp.max(blk_rmax)                                       # scalar block max
    p = jnp.exp(logits - blk_rmax)                              # (bn, bm), reused below

    # Online row logsumexp (reduction over column blocks j).
    m_row_new = jnp.maximum(m_row[...], blk_rmax)
    l_row[...] = (l_row[...] * jnp.exp(m_row[...] - m_row_new)
                  + jnp.sum(p, axis=1, keepdims=True) * jnp.exp(blk_rmax - m_row_new))
    m_row[...] = m_row_new

    # Online column logsumexp (reduction over row blocks i), reusing p:
    #   sum_i exp(logits[i,j] - g) = sum_i p[i,j] * exp(blk_rmax[i] - g)
    col_part = jnp.sum(p * jnp.exp(blk_rmax - g), axis=0, keepdims=True)   # (1, bm)
    m_col_old = m_col[j]
    m_col_new = jnp.maximum(m_col_old, g)
    l_col[j] = (l_col[j] * jnp.exp(m_col_old - m_col_new)
                + col_part * jnp.exp(g - m_col_new))
    m_col[j] = m_col_new

    # ---------------- finalize this row block ----------------
    @pl.when(j == nj - 1)
    def _():
        lse_row = m_row[...] + jnp.log(l_row[...])              # l_row >= 1 always
        s_row[...] += jnp.sum(lse_row * rcnt[...])

    # ---------------- finalize loss ----------------
    @pl.when(jnp.logical_and(i == ni - 1, j == nj - 1))
    def _():
        # Guard against full underflow of a column's sum (keeps the loss finite).
        lse_col = m_col[...] + jnp.log(jnp.maximum(l_col[...], 1e-30))
        s_col_total = jnp.sum(jnp.where(ccnt[...] > 0.0, lse_col * ccnt[...], 0.0))
        # loss1 = (sum_row lse_row*rcnt - s_dot)/cnt ; loss2 = (sum_col lse_col*ccnt - s_dot)/cnt
        total = s_row[...] + s_col_total - 2.0 * s_dot[...]
        inv_cnt = pl.reciprocal(jnp.maximum(s_cnt[...], 1.0), approx=False)
        out_ref[...] = 0.5 * total * inv_cnt


def _pick_block(n, candidates=(256, 128)):
    for c in candidates:
        if n >= c and n % c == 0:
            return c
    return n  # fall back to a single full-extent block


def clip_loss(t, vectors1, vectors2, v1_labels):
    """t: (1,1) or (1,) f32; vectors1: (N,D); vectors2: (M,D); v1_labels: (N,M) binary."""
    n, d = vectors1.shape
    m, d2 = vectors2.shape
    assert d == d2 and v1_labels.shape == (n, m)

    # Pad the feature dim to a multiple of 128 lanes (zero padding changes neither
    # the norms nor the dot products).
    dp = max(128, ((d + 127) // 128) * 128)
    if dp != d:
        vectors1 = jnp.pad(vectors1, ((0, 0), (0, dp - d)))
        vectors2 = jnp.pad(vectors2, ((0, 0), (0, dp - d)))

    bn = _pick_block(n)
    bm = _pick_block(m)
    ni = n // bn
    nj = m // bm

    t = jnp.asarray(t, jnp.float32).reshape(1, 1)

    grid_spec = pltpu.PrefetchScalarGridSpec(
        num_scalar_prefetch=0,
        grid=(ni, nj),
        in_specs=[
            pl.BlockSpec(memory_space=pltpu.SMEM),             # learnable temperature t
            pl.BlockSpec((bn, dp), lambda i, j: (i, 0)),       # vectors1 row tile
            pl.BlockSpec((bm, dp), lambda i, j: (j, 0)),       # vectors2 row tile
            pl.BlockSpec((bn, bm), lambda i, j: (i, j)),       # labels tile (streams, general multi-hot)
        ],
        out_specs=pl.BlockSpec((1, 1), lambda i, j: (0, 0)),
        scratch_shapes=[
            pltpu.VMEM((bn, 1), jnp.float32),                  # m_row
            pltpu.VMEM((bn, 1), jnp.float32),                  # l_row
            pltpu.VMEM((bn, 1), jnp.float32),                  # rcnt
            pltpu.VMEM((nj, 1, bm), jnp.float32),              # m_col
            pltpu.VMEM((nj, 1, bm), jnp.float32),              # l_col
            pltpu.VMEM((nj, 1, bm), jnp.float32),              # ccnt
            pltpu.VMEM((1, 1), jnp.float32),                   # s_row
            pltpu.VMEM((1, 1), jnp.float32),                   # s_dot
            pltpu.VMEM((1, 1), jnp.float32),                   # s_cnt
        ],
    )

    return pl.pallas_call(
        _clip_loss_kernel,
        out_shape=jax.ShapeDtypeStruct((1, 1), jnp.float32),
        grid_spec=grid_spec,
        compiler_params=pltpu.CompilerParams(
            # Both axes carry cross-iteration state (row/column LSE accumulators),
            # so neither can be megacore-parallel.
            dimension_semantics=("arbitrary", "arbitrary"),
        ),
    )(t, vectors1, vectors2, v1_labels)


def clip_loss_ref(t, v1, v2, lab):
    """Pure-JAX reference mirroring the PyTorch forward exactly."""
    eps = 1e-12
    v1n = v1 / jnp.maximum(jnp.linalg.norm(v1, axis=1, keepdims=True), eps)
    v2n = v2 / jnp.maximum(jnp.linalg.norm(v2, axis=1, keepdims=True), eps)
    logits = v1n @ v2n.T * jnp.exp(jnp.reshape(t, ())[()])
    p_row = jax.nn.softmax(logits, axis=1)
    p_colT = jax.nn.softmax(logits.T, axis=1)
    mask = lab == 1.0
    cnt = jnp.sum(mask)
    l1 = -jnp.sum(jnp.where(mask, jnp.log(p_row), 0.0)) / cnt
    l2 = -jnp.sum(jnp.where(mask.T, jnp.log(p_colT), 0.0)) / cnt
    return (l1 + l2) / 2.0


if __name__ == "__main__":
    key = jax.random.PRNGKey(0)
    k1, k2, k3, k4 = jax.random.split(key, 4)

    # Parameter init from the module: self.t = nn.Parameter(torch.tensor([0.0]))
    t = jnp.zeros((1, 1), dtype=jnp.float32)

    # --- small single-block case (also exercises the D-padding path) ---
    n_s, d_s = 8, 32
    v1_s = jax.random.normal(k1, (n_s, d_s), dtype=jnp.float32)
    v2_s = jax.random.normal(k2, (n_s, d_s), dtype=jnp.float32)
    lab_s = jnp.eye(n_s, dtype=jnp.float32)          # one-hot pairing labels

    out_s = jax.block_until_ready(clip_loss(t, v1_s, v2_s, lab_s))
    ref_s = clip_loss_ref(t, v1_s, v2_s, lab_s)
    assert jnp.allclose(out_s[0, 0], ref_s, rtol=2e-5, atol=2e-5), (out_s, ref_s)

    # --- tiled case: 2x2 grid of 256x256 logits blocks ---
    n_t, d_t = 512, 128
    v1_t = jax.random.normal(k3, (n_t, d_t), dtype=jnp.float32)
    v2_t = jax.random.normal(k4, (n_t, d_t), dtype=jnp.float32)
    lab_t = jnp.eye(n_t, dtype=jnp.float32)

    out_t = jax.block_until_ready(clip_loss(t, v1_t, v2_t, lab_t))
    ref_t = clip_loss_ref(t, v1_t, v2_t, lab_t)
    assert jnp.allclose(out_t[0, 0], ref_t, rtol=2e-5, atol=2e-5), (out_t, ref_t)

    print("KERNEL_OK")
</pallas_src>

<mosaic_0001>
module attributes {stable_mosaic.version = 11 : i64} {
  func.func @_clip_loss_kernel(%arg0: i32, %arg1: i32, %arg2: memref<1x1xf32, #tpu.memory_space<smem>>, %arg3: memref<8x128xf32, #tpu.memory_space<vmem>>, %arg4: memref<8x128xf32, #tpu.memory_space<vmem>>, %arg5: memref<8x8xf32, #tpu.memory_space<vmem>>, %arg6: memref<1x1xf32, #tpu.memory_space<vmem>>, %arg7: memref<8x1xf32, #tpu.memory_space<vmem>>, %arg8: memref<8x1xf32, #tpu.memory_space<vmem>>, %arg9: memref<8x1xf32, #tpu.memory_space<vmem>>, %arg10: memref<1x1x8xf32, #tpu.memory_space<vmem>>, %arg11: memref<1x1x8xf32, #tpu.memory_space<vmem>>, %arg12: memref<1x1x8xf32, #tpu.memory_space<vmem>>, %arg13: memref<1x1xf32, #tpu.memory_space<vmem>>, %arg14: memref<1x1xf32, #tpu.memory_space<vmem>>, %arg15: memref<1x1xf32, #tpu.memory_space<vmem>>) attributes {dimension_semantics = [#tpu.dimension_semantics<arbitrary>, #tpu.dimension_semantics<arbitrary>], iteration_bounds = array<i64: 1, 1>, scalar_prefetch = 0 : i64, scratch_operands = 9 : i64, tpu.core_type = #tpu.core_type<tc>, window_params = [{transform_indices = @transform_0, window_bounds = array<i64: 1, 1>}, {transform_indices = @transform_1, window_bounds = array<i64: 8, 128>}, {transform_indices = @transform_2, window_bounds = array<i64: 8, 128>}, {transform_indices = @transform_3, window_bounds = array<i64: 8, 8>}, {pipeline_mode = #tpu.pipeline_mode<synchronous>, transform_indices = @transform_4, window_bounds = array<i64: 1, 1>}]} {
    %c0_i32 = arith.constant 0 : i32
    %0 = arith.cmpi eq, %arg0, %c0_i32 : i32
    %c0_i32_0 = arith.constant 0 : i32
    %1 = arith.cmpi eq, %arg1, %c0_i32_0 : i32
    %2 = arith.andi %0, %1 : i1
    %3 = arith.extui %2 : i1 to i32
    %c0_i32_1 = arith.constant 0 : i32
    %4 = arith.cmpi ne, %3, %c0_i32_1 : i32
    scf.if %4 {
      %cst_65 = arith.constant 0.000000e+00 : f32
      %134 = vector.broadcast %cst_65 : f32 to vector<1x1xf32>
      %c0_66 = arith.constant 0 : index
      %c0_67 = arith.constant 0 : index
      %135 = vector.load %arg13[%c0_66, %c0_67] : memref<1x1xf32, #tpu.memory_space<vmem>>, vector<1x1xf32>
      tpu.vector_store %arg13[%c0_66, %c0_67], %134 {strides = array<i32>} : memref<1x1xf32, #tpu.memory_space<vmem>>, vector<1x1xf32>,
      %cst_68 = arith.constant 0.000000e+00 : f32
      %136 = vector.broadcast %cst_68 : f32 to vector<1x1xf32>
      %c0_69 = arith.constant 0 : index
      %c0_70 = arith.constant 0 : index
      %137 = vector.load %arg14[%c0_69, %c0_70] : memref<1x1xf32, #tpu.memory_space<vmem>>, vector<1x1xf32>
      tpu.vector_store %arg14[%c0_69, %c0_70], %136 {strides = array<i32>} : memref<1x1xf32, #tpu.memory_space<vmem>>, vector<1x1xf32>,
      %cst_71 = arith.constant 0.000000e+00 : f32
      %138 = vector.broadcast %cst_71 : f32 to vector<1x1xf32>
      %c0_72 = arith.constant 0 : index
      %c0_73 = arith.constant 0 : index
      %139 = vector.load %arg15[%c0_72, %c0_73] : memref<1x1xf32, #tpu.memory_space<vmem>>, vector<1x1xf32>
      tpu.vector_store %arg15[%c0_72, %c0_73], %138 {strides = array<i32>} : memref<1x1xf32, #tpu.memory_space<vmem>>, vector<1x1xf32>,
    } else {
    }
    %c0_i32_2 = arith.constant 0 : i32
    %5 = arith.cmpi eq, %arg0, %c0_i32_2 : i32
    %6 = arith.extui %5 : i1 to i32
    %c0_i32_3 = arith.constant 0 : i32
    %7 = arith.cmpi ne, %6, %c0_i32_3 : i32
    scf.if %7 {
      %cst_65 = arith.constant 0xFF800000 : f32
      %134 = vector.broadcast %cst_65 : f32 to vector<1x8xf32>
      %135 = arith.index_cast %arg1 : i32 to index
      %c0_66 = arith.constant 0 : index
      %c0_67 = arith.constant 0 : index
      %136 = vector.load %arg10[%135, %c0_66, %c0_67] : memref<1x1x8xf32, #tpu.memory_space<vmem>>, vector<1x1x8xf32>
      %137 = vector.shape_cast %136 : vector<1x1x8xf32> to vector<1x8xf32>
      %138 = vector.shape_cast %134 : vector<1x8xf32> to vector<1x1x8xf32>
      tpu.vector_store %arg10[%135, %c0_66, %c0_67], %138 {strides = array<i32>} : memref<1x1x8xf32, #tpu.memory_space<vmem>>, vector<1x1x8xf32>,
      %cst_68 = arith.constant 0.000000e+00 : f32
      %139 = vector.broadcast %cst_68 : f32 to vector<1x8xf32>
      %140 = arith.index_cast %arg1 : i32 to index
      %c0_69 = arith.constant 0 : index
      %c0_70 = arith.constant 0 : index
      %141 = vector.load %arg11[%140, %c0_69, %c0_70] : memref<1x1x8xf32, #tpu.memory_space<vmem>>, vector<1x1x8xf32>
      %142 = vector.shape_cast %141 : vector<1x1x8xf32> to vector<1x8xf32>
      %143 = vector.shape_cast %139 : vector<1x8xf32> to vector<1x1x8xf32>
      tpu.vector_store %arg11[%140, %c0_69, %c0_70], %143 {strides = array<i32>} : memref<1x1x8xf32, #tpu.memory_space<vmem>>, vector<1x1x8xf32>,
      %cst_71 = arith.constant 0.000000e+00 : f32
      %144 = vector.broadcast %cst_71 : f32 to vector<1x8xf32>
      %145 = arith.index_cast %arg1 : i32 to index
      %c0_72 = arith.constant 0 : index
      %c0_73 = arith.constant 0 : index
      %146 = vector.load %arg12[%145, %c0_72, %c0_73] : memref<1x1x8xf32, #tpu.memory_space<vmem>>, vector<1x1x8xf32>
      %147 = vector.shape_cast %146 : vector<1x1x8xf32> to vector<1x8xf32>
      %148 = vector.shape_cast %144 : vector<1x8xf32> to vector<1x1x8xf32>
      tpu.vector_store %arg12[%145, %c0_72, %c0_73], %148 {strides = array<i32>} : memref<1x1x8xf32, #tpu.memory_space<vmem>>, vector<1x1x8xf32>,
    } else {
    }
    %c0_i32_4 = arith.constant 0 : i32
    %8 = arith.cmpi eq, %arg1, %c0_i32_4 : i32
    %9 = arith.extui %8 : i1 to i32
    %c0_i32_5 = arith.constant 0 : i32
    %10 = arith.cmpi ne, %9, %c0_i32_5 : i32
    scf.if %10 {
      %cst_65 = arith.constant 0xFF800000 : f32
      %134 = vector.broadcast %cst_65 : f32 to vector<8x1xf32>
      %c0_66 = arith.constant 0 : index
      %c0_67 = arith.constant 0 : index
      %135 = vector.load %arg7[%c0_66, %c0_67] : memref<8x1xf32, #tpu.memory_space<vmem>>, vector<8x1xf32>
      tpu.vector_store %arg7[%c0_66, %c0_67], %134 {strides = array<i32>} : memref<8x1xf32, #tpu.memory_space<vmem>>, vector<8x1xf32>,
      %cst_68 = arith.constant 0.000000e+00 : f32
      %136 = vector.broadcast %cst_68 : f32 to vector<8x1xf32>
      %c0_69 = arith.constant 0 : index
      %c0_70 = arith.constant 0 : index
      %137 = vector.load %arg8[%c0_69, %c0_70] : memref<8x1xf32, #tpu.memory_space<vmem>>, vector<8x1xf32>
      tpu.vector_store %arg8[%c0_69, %c0_70], %136 {strides = array<i32>} : memref<8x1xf32, #tpu.memory_space<vmem>>, vector<8x1xf32>,
      %cst_71 = arith.constant 0.000000e+00 : f32
      %138 = vector.broadcast %cst_71 : f32 to vector<8x1xf32>
      %c0_72 = arith.constant 0 : index
      %c0_73 = arith.constant 0 : index
      %139 = vector.load %arg9[%c0_72, %c0_73] : memref<8x1xf32, #tpu.memory_space<vmem>>, vector<8x1xf32>
      tpu.vector_store %arg9[%c0_72, %c0_73], %138 {strides = array<i32>} : memref<8x1xf32, #tpu.memory_space<vmem>>, vector<8x1xf32>,
    } else {
    }
    %c0 = arith.constant 0 : index
    %c0_6 = arith.constant 0 : index
    %11 = vector.load %arg3[%c0, %c0_6] : memref<8x128xf32, #tpu.memory_space<vmem>>, vector<8x128xf32>
    %c0_7 = arith.constant 0 : index
    %c0_8 = arith.constant 0 : index
    %12 = vector.load %arg4[%c0_7, %c0_8] : memref<8x128xf32, #tpu.memory_space<vmem>>, vector<8x128xf32>
    %13 = arith.mulf %11, %11 : vector<8x128xf32>
    %cst = arith.constant dense<0.000000e+00> : vector<8xf32>
    %14 = vector.multi_reduction <add>, %13, %cst [1] : vector<8x128xf32> to vector<8xf32>
    %15 = vector.shape_cast %14 : vector<8xf32> to vector<8x1xf32>
    %cst_9 = arith.constant 1.000000e-24 : f32
    %16 = vector.broadcast %cst_9 : f32 to vector<8x1xf32>
    %17 = arith.maximumf %15, %16 : vector<8x1xf32>
    %18 = math.rsqrt %17 : vector<8x1xf32>
    %19 = vector.broadcast %18 : vector<8x1xf32> to vector<8x128xf32>
    %20 = arith.mulf %11, %19 : vector<8x128xf32>
    %21 = arith.mulf %12, %12 : vector<8x128xf32>
    %cst_10 = arith.constant dense<0.000000e+00> : vector<8xf32>
    %22 = vector.multi_reduction <add>, %21, %cst_10 [1] : vector<8x128xf32> to vector<8xf32>
    %23 = vector.shape_cast %22 : vector<8xf32> to vector<8x1xf32>
    %cst_11 = arith.constant 1.000000e-24 : f32
    %24 = vector.broadcast %cst_11 : f32 to vector<8x1xf32>
    %25 = arith.maximumf %23, %24 : vector<8x1xf32>
    %26 = math.rsqrt %25 : vector<8x1xf32>
    %27 = vector.broadcast %26 : vector<8x1xf32> to vector<8x128xf32>
    %28 = arith.mulf %12, %27 : vector<8x128xf32>
    %c0_12 = arith.constant 0 : index
    %c0_13 = arith.constant 0 : index
    %29 = memref.load %arg2[%c0_12, %c0_13] : memref<1x1xf32, #tpu.memory_space<smem>>
    %30 = math.exp %29 : f32
    %cst_14 = arith.constant dense<0.000000e+00> : vector<8x8xf32>
    %31 = tpu.matmul %20, %28, %cst_14 {dimension_numbers = #tpu.dot_dimension_numbers<[1], [1], [0], [0], [0, 0, 1, 0], [], []>} : vector<8x128xf32>, vector<8x128xf32>, vector<8x8xf32> -> vector<8x8xf32>
    %32 = vector.broadcast %30 : f32 to vector<8x8xf32>
    %33 = arith.mulf %31, %32 : vector<8x8xf32>
    %c0_15 = arith.constant 0 : index
    %c0_16 = arith.constant 0 : index
    %34 = vector.load %arg5[%c0_15, %c0_16] : memref<8x8xf32, #tpu.memory_space<vmem>>, vector<8x8xf32>
    %cst_17 = arith.constant 1.000000e+00 : f32
    %35 = vector.broadcast %cst_17 : f32 to vector<8x8xf32>
    %36 = arith.cmpf oeq, %34, %35 : vector<8x8xf32>
    %37 = arith.extui %36 : vector<8x8xi1> to vector<8x8xi32>
    %38 = arith.sitofp %37 : vector<8x8xi32> to vector<8x8xf32>
    %c0_18 = arith.constant 0 : index
    %c0_19 = arith.constant 0 : index
    %39 = vector.load %arg14[%c0_18, %c0_19] : memref<1x1xf32, #tpu.memory_space<vmem>>, vector<1x1xf32>
    %40 = arith.mulf %38, %33 : vector<8x8xf32>
    %41 = vector.shape_cast %40 : vector<8x8xf32> to vector<1x8x8xf32>
    %cst_20 = arith.constant dense<0.000000e+00> : vector<1xf32>
    %42 = vector.multi_reduction <add>, %41, %cst_20 [1, 2] : vector<1x8x8xf32> to vector<1xf32>
    %43 = vector.shape_cast %42 : vector<1xf32> to vector<1x1x1xf32>
    %44 = vector.extract %43[0, 0, 0] : f32 from vector<1x1x1xf32>
    %45 = vector.broadcast %44 : f32 to vector<1x1xf32>
    %46 = arith.addf %39, %45 : vector<1x1xf32>
    %c0_21 = arith.constant 0 : index
    %c0_22 = arith.constant 0 : index
    %47 = vector.load %arg14[%c0_21, %c0_22] : memref<1x1xf32, #tpu.memory_space<vmem>>, vector<1x1xf32>
    tpu.vector_store %arg14[%c0_21, %c0_22], %46 {strides = array<i32>} : memref<1x1xf32, #tpu.memory_space<vmem>>, vector<1x1xf32>,
    %c0_23 = arith.constant 0 : index
    %c0_24 = arith.constant 0 : index
    %48 = vector.load %arg15[%c0_23, %c0_24] : memref<1x1xf32, #tpu.memory_space<vmem>>, vector<1x1xf32>
    %49 = vector.shape_cast %38 : vector<8x8xf32> to vector<1x8x8xf32>
    %cst_25 = arith.constant dense<0.000000e+00> : vector<1xf32>
    %50 = vector.multi_reduction <add>, %49, %cst_25 [1, 2] : vector<1x8x8xf32> to vector<1xf32>
    %51 = vector.shape_cast %50 : vector<1xf32> to vector<1x1x1xf32>
    %52 = vector.extract %51[0, 0, 0] : f32 from vector<1x1x1xf32>
    %53 = vector.broadcast %52 : f32 to vector<1x1xf32>
    %54 = arith.addf %48, %53 : vector<1x1xf32>
    %c0_26 = arith.constant 0 : index
    %c0_27 = arith.constant 0 : index
    %55 = vector.load %arg15[%c0_26, %c0_27] : memref<1x1xf32, #tpu.memory_space<vmem>>, vector<1x1xf32>
    tpu.vector_store %arg15[%c0_26, %c0_27], %54 {strides = array<i32>} : memref<1x1xf32, #tpu.memory_space<vmem>>, vector<1x1xf32>,
    %c0_28 = arith.constant 0 : index
    %c0_29 = arith.constant 0 : index
    %56 = vector.load %arg9[%c0_28, %c0_29] : memref<8x1xf32, #tpu.memory_space<vmem>>, vector<8x1xf32>
    %cst_30 = arith.constant dense<0.000000e+00> : vector<8xf32>
    %57 = vector.multi_reduction <add>, %38, %cst_30 [1] : vector<8x8xf32> to vector<8xf32>
    %58 = vector.shape_cast %57 : vector<8xf32> to vector<8x1xf32>
    %59 = arith.addf %56, %58 : vector<8x1xf32>
    %c0_31 = arith.constant 0 : index
    %c0_32 = arith.constant 0 : index
    %60 = vector.load %arg9[%c0_31, %c0_32] : memref<8x1xf32, #tpu.memory_space<vmem>>, vector<8x1xf32>
    tpu.vector_store %arg9[%c0_31, %c0_32], %59 {strides = array<i32>} : memref<8x1xf32, #tpu.memory_space<vmem>>, vector<8x1xf32>,
    %61 = arith.index_cast %arg1 : i32 to index
    %c0_33 = arith.constant 0 : index
    %c0_34 = arith.constant 0 : index
    %62 = vector.load %arg12[%61, %c0_33, %c0_34] : memref<1x1x8xf32, #tpu.memory_space<vmem>>, vector<1x1x8xf32>
    %63 = vector.shape_cast %62 : vector<1x1x8xf32> to vector<1x8xf32>
    %cst_35 = arith.constant dense<0.000000e+00> : vector<8xf32>
    %64 = vector.multi_reduction <add>, %38, %cst_35 [0] : vector<8x8xf32> to vector<8xf32>
    %65 = vector.shape_cast %64 : vector<8xf32> to vector<1x8xf32>
    %66 = arith.addf %63, %65 : vector<1x8xf32>
    %67 = arith.index_cast %arg1 : i32 to index
    %c0_36 = arith.constant 0 : index
    %c0_37 = arith.constant 0 : index
    %68 = vector.load %arg12[%67, %c0_36, %c0_37] : memref<1x1x8xf32, #tpu.memory_space<vmem>>, vector<1x1x8xf32>
    %69 = vector.shape_cast %68 : vector<1x1x8xf32> to vector<1x8xf32>
    %70 = vector.shape_cast %66 : vector<1x8xf32> to vector<1x1x8xf32>
    tpu.vector_store %arg12[%67, %c0_36, %c0_37], %70 {strides = array<i32>} : memref<1x1x8xf32, #tpu.memory_space<vmem>>, vector<1x1x8xf32>,
    %cst_38 = arith.constant dense<0xFF800000> : vector<8xf32>
    %71 = vector.multi_reduction <maximumf>, %33, %cst_38 [1] : vector<8x8xf32> to vector<8xf32>
    %72 = vector.shape_cast %71 : vector<8xf32> to vector<8x1xf32>
    %73 = vector.shape_cast %72 : vector<8x1xf32> to vector<1x8x1xf32>
    %cst_39 = arith.constant dense<0xFF800000> : vector<1xf32>
    %74 = vector.multi_reduction <maximumf>, %73, %cst_39 [1, 2] : vector<1x8x1xf32> to vector<1xf32>
    %75 = vector.shape_cast %74 : vector<1xf32> to vector<1x1x1xf32>
    %76 = vector.extract %75[0, 0, 0] : f32 from vector<1x1x1xf32>
    %77 = vector.broadcast %72 : vector<8x1xf32> to vector<8x8xf32>
    %78 = arith.subf %33, %77 : vector<8x8xf32>
    %79 = math.exp %78 : vector<8x8xf32>
    %c0_40 = arith.constant 0 : index
    %c0_41 = arith.constant 0 : index
    %80 = vector.load %arg7[%c0_40, %c0_41] : memref<8x1xf32, #tpu.memory_space<vmem>>, vector<8x1xf32>
    %81 = arith.maximumf %80, %72 : vector<8x1xf32>
    %c0_42 = arith.constant 0 : index
    %c0_43 = arith.constant 0 : index
    %82 = vector.load %arg8[%c0_42, %c0_43] : memref<8x1xf32, #tpu.memory_space<vmem>>, vector<8x1xf32>
    %c0_44 = arith.constant 0 : index
    %c0_45 = arith.constant 0 : index
    %83 = vector.load %arg7[%c0_44, %c0_45] : memref<8x1xf32, #tpu.memory_space<vmem>>, vector<8x1xf32>
    %84 = arith.subf %83, %81 : vector<8x1xf32>
    %85 = math.exp %84 : vector<8x1xf32>
    %86 = arith.mulf %82, %85 : vector<8x1xf32>
    %cst_46 = arith.constant dense<0.000000e+00> : vector<8xf32>
    %87 = vector.multi_reduction <add>, %79, %cst_46 [1] : vector<8x8xf32> to vector<8xf32>
    %88 = vector.shape_cast %87 : vector<8xf32> to vector<8x1xf32>
    %89 = arith.subf %72, %81 : vector<8x1xf32>
    %90 = math.exp %89 : vector<8x1xf32>
    %91 = arith.mulf %88, %90 : vector<8x1xf32>
    %92 = arith.addf %86, %91 : vector<8x1xf32>
    %c0_47 = arith.constant 0 : index
    %c0_48 = arith.constant 0 : index
    %93 = vector.load %arg8[%c0_47, %c0_48] : memref<8x1xf32, #tpu.memory_space<vmem>>, vector<8x1xf32>
    tpu.vector_store %arg8[%c0_47, %c0_48], %92 {strides = array<i32>} : memref<8x1xf32, #tpu.memory_space<vmem>>, vector<8x1xf32>,
    %c0_49 = arith.constant 0 : index
    %c0_50 = arith.constant 0 : index
    %94 = vector.load %arg7[%c0_49, %c0_50] : memref<8x1xf32, #tpu.memory_space<vmem>>, vector<8x1xf32>
    tpu.vector_store %arg7[%c0_49, %c0_50], %81 {strides = array<i32>} : memref<8x1xf32, #tpu.memory_space<vmem>>, vector<8x1xf32>,
    %95 = vector.broadcast %76 : f32 to vector<8x1xf32>
    %96 = arith.subf %72, %95 : vector<8x1xf32>
    %97 = math.exp %96 : vector<8x1xf32>
    %98 = vector.broadcast %97 : vector<8x1xf32> to vector<8x8xf32>
    %99 = arith.mulf %79, %98 : vector<8x8xf32>
    %cst_51 = arith.constant dense<0.000000e+00> : vector<8xf32>
    %100 = vector.multi_reduction <add>, %99, %cst_51 [0] : vector<8x8xf32> to vector<8xf32>
    %101 = vector.shape_cast %100 : vector<8xf32> to vector<1x8xf32>
    %102 = arith.index_cast %arg1 : i32 to index
    %c0_52 = arith.constant 0 : index
    %c0_53 = arith.constant 0 : index
    %103 = vector.load %arg10[%102, %c0_52, %c0_53] : memref<1x1x8xf32, #tpu.memory_space<vmem>>, vector<1x1x8xf32>
    %104 = vector.shape_cast %103 : vector<1x1x8xf32> to vector<1x8xf32>
    %105 = vector.broadcast %76 : f32 to vector<1x8xf32>
    %106 = arith.maximumf %104, %105 : vector<1x8xf32>
    %107 = arith.index_cast %arg1 : i32 to index
    %c0_54 = arith.constant 0 : index
    %c0_55 = arith.constant 0 : index
    %108 = vector.load %arg11[%107, %c0_54, %c0_55] : memref<1x1x8xf32, #tpu.memory_space<vmem>>, vector<1x1x8xf32>
    %109 = vector.shape_cast %108 : vector<1x1x8xf32> to vector<1x8xf32>
    %110 = arith.subf %104, %106 : vector<1x8xf32>
    %111 = math.exp %110 : vector<1x8xf32>
    %112 = arith.mulf %109, %111 : vector<1x8xf32>
    %113 = vector.broadcast %76 : f32 to vector<1x8xf32>
    %114 = arith.subf %113, %106 : vector<1x8xf32>
    %115 = math.exp %114 : vector<1x8xf32>
    %116 = arith.mulf %101, %115 : vector<1x8xf32>
    %117 = arith.addf %112, %116 : vector<1x8xf32>
    %118 = arith.index_cast %arg1 : i32 to index
    %c0_56 = arith.constant 0 : index
    %c0_57 = arith.constant 0 : index
    %119 = vector.load %arg11[%118, %c0_56, %c0_57] : memref<1x1x8xf32, #tpu.memory_space<vmem>>, vector<1x1x8xf32>
    %120 = vector.shape_cast %119 : vector<1x1x8xf32> to vector<1x8xf32>
    %121 = vector.shape_cast %117 : vector<1x8xf32> to vector<1x1x8xf32>
    tpu.vector_store %arg11[%118, %c0_56, %c0_57], %121 {strides = array<i32>} : memref<1x1x8xf32, #tpu.memory_space<vmem>>, vector<1x1x8xf32>,
    %122 = arith.index_cast %arg1 : i32 to index
    %c0_58 = arith.constant 0 : index
    %c0_59 = arith.constant 0 : index
    %123 = vector.load %arg10[%122, %c0_58, %c0_59] : memref<1x1x8xf32, #tpu.memory_space<vmem>>, vector<1x1x8xf32>
    %124 = vector.shape_cast %123 : vector<1x1x8xf32> to vector<1x8xf32>
    %125 = vector.shape_cast %106 : vector<1x8xf32> to vector<1x1x8xf32>
    tpu.vector_store %arg10[%122, %c0_58, %c0_59], %125 {strides = array<i32>} : memref<1x1x8xf32, #tpu.memory_space<vmem>>, vector<1x1x8xf32>,
    %c0_i32_60 = arith.constant 0 : i32
    %126 = arith.cmpi eq, %arg1, %c0_i32_60 : i32
    %127 = arith.extui %126 : i1 to i32
    %c0_i32_61 = arith.constant 0 : i32
    %128 = arith.cmpi ne, %127, %c0_i32_61 : i32
    scf.if %128 {
      %c0_65 = arith.constant 0 : index
      %c0_66 = arith.constant 0 : index
      %134 = vector.load %arg7[%c0_65, %c0_66] : memref<8x1xf32, #tpu.memory_space<vmem>>, vector<8x1xf32>
      %c0_67 = arith.constant 0 : index
      %c0_68 = arith.constant 0 : index
      %135 = vector.load %arg8[%c0_67, %c0_68] : memref<8x1xf32, #tpu.memory_space<vmem>>, vector<8x1xf32>
      %136 = math.log %135 : vector<8x1xf32>
      %137 = arith.addf %134, %136 : vector<8x1xf32>
      %c0_69 = arith.constant 0 : index
      %c0_70 = arith.constant 0 : index
      %138 = vector.load %arg13[%c0_69, %c0_70] : memref<1x1xf32, #tpu.memory_space<vmem>>, vector<1x1xf32>
      %c0_71 = arith.constant 0 : index
      %c0_72 = arith.constant 0 : index
      %139 = vector.load %arg9[%c0_71, %c0_72] : memref<8x1xf32, #tpu.memory_space<vmem>>, vector<8x1xf32>
      %140 = arith.mulf %137, %139 : vector<8x1xf32>
      %141 = vector.shape_cast %140 : vector<8x1xf32> to vector<1x8x1xf32>
      %cst_73 = arith.constant dense<0.000000e+00> : vector<1xf32>
      %142 = vector.multi_reduction <add>, %141, %cst_73 [1, 2] : vector<1x8x1xf32> to vector<1xf32>
      %143 = vector.shape_cast %142 : vector<1xf32> to vector<1x1x1xf32>
      %144 = vector.extract %143[0, 0, 0] : f32 from vector<1x1x1xf32>
      %145 = vector.broadcast %144 : f32 to vector<1x1xf32>
      %146 = arith.addf %138, %145 : vector<1x1xf32>
      %c0_74 = arith.constant 0 : index
      %c0_75 = arith.constant 0 : index
      %147 = vector.load %arg13[%c0_74, %c0_75] : memref<1x1xf32, #tpu.memory_space<vmem>>, vector<1x1xf32>
      tpu.vector_store %arg13[%c0_74, %c0_75], %146 {strides = array<i32>} : memref<1x1xf32, #tpu.memory_space<vmem>>, vector<1x1xf32>,
    } else {
    }
    %c0_i32_62 = arith.constant 0 : i32
    %129 = arith.cmpi eq, %arg0, %c0_i32_62 : i32
    %c0_i32_63 = arith.constant 0 : i32
    %130 = arith.cmpi eq, %arg1, %c0_i32_63 : i32
    %131 = arith.andi %129, %130 : i1
    %132 = arith.extui %131 : i1 to i32
    %c0_i32_64 = arith.constant 0 : i32
    %133 = arith.cmpi ne, %132, %c0_i32_64 : i32
    scf.if %133 {
      %c0_65 = arith.constant 0 : index
      %c0_66 = arith.constant 0 : index
      %c0_67 = arith.constant 0 : index
      %134 = vector.load %arg10[%c0_65, %c0_66, %c0_67] : memref<1x1x8xf32, #tpu.memory_space<vmem>>, vector<1x1x8xf32>
      %c0_68 = arith.constant 0 : index
      %c0_69 = arith.constant 0 : index
      %c0_70 = arith.constant 0 : index
      %135 = vector.load %arg11[%c0_68, %c0_69, %c0_70] : memref<1x1x8xf32, #tpu.memory_space<vmem>>, vector<1x1x8xf32>
      %cst_71 = arith.constant 1.000000e-30 : f32
      %136 = vector.broadcast %cst_71 : f32 to vector<1x1x8xf32>
      %137 = arith.maximumf %135, %136 : vector<1x1x8xf32>
      %138 = math.log %137 : vector<1x1x8xf32>
      %139 = arith.addf %134, %138 : vector<1x1x8xf32>
      %c0_72 = arith.constant 0 : index
      %c0_73 = arith.constant 0 : index
      %c0_74 = arith.constant 0 : index
      %140 = vector.load %arg12[%c0_72, %c0_73, %c0_74] : memref<1x1x8xf32, #tpu.memory_space<vmem>>, vector<1x1x8xf32>
      %cst_75 = arith.constant 0.000000e+00 : f32
      %141 = vector.broadcast %cst_75 : f32 to vector<1x1x8xf32>
      %142 = arith.cmpf ogt, %140, %141 : vector<1x1x8xf32>
      %c0_76 = arith.constant 0 : index
      %c0_77 = arith.constant 0 : index
      %c0_78 = arith.constant 0 : index
      %143 = vector.load %arg12[%c0_76, %c0_77, %c0_78] : memref<1x1x8xf32, #tpu.memory_space<vmem>>, vector<1x1x8xf32>
      %144 = arith.mulf %139, %143 : vector<1x1x8xf32>
      %cst_79 = arith.constant 0.000000e+00 : f32
      %145 = vector.broadcast %cst_79 : f32 to vector<1x1x8xf32>
      %146 = arith.select %142, %144, %145 : vector<1x1x8xi1>, vector<1x1x8xf32>
      %147 = vector.shape_cast %146 : vector<1x1x8xf32> to vector<1x1x1x8xf32>
      %cst_80 = arith.constant dense<0.000000e+00> : vector<1xf32>
      %148 = vector.multi_reduction <add>, %147, %cst_80 [1, 2, 3] : vector<1x1x1x8xf32> to vector<1xf32>
      %149 = vector.shape_cast %148 : vector<1xf32> to vector<1x1x1x1xf32>
      %150 = vector.extract %149[0, 0, 0, 0] : f32 from vector<1x1x1x1xf32>
      %c0_81 = arith.constant 0 : index
      %c0_82 = arith.constant 0 : index
      %151 = vector.load %arg13[%c0_81, %c0_82] : memref<1x1xf32, #tpu.memory_space<vmem>>, vector<1x1xf32>
      %152 = vector.broadcast %150 : f32 to vector<1x1xf32>
      %153 = arith.addf %151, %152 : vector<1x1xf32>
      %c0_83 = arith.constant 0 : index
      %c0_84 = arith.constant 0 : index
      %154 = vector.load %arg14[%c0_83, %c0_84] : memref<1x1xf32, #tpu.memory_space<vmem>>, vector<1x1xf32>
      %cst_85 = arith.constant 2.000000e+00 : f32
      %155 = vector.broadcast %cst_85 : f32 to vector<1x1xf32>
      %156 = arith.mulf %155, %154 : vector<1x1xf32>
      %157 = arith.subf %153, %156 : vector<1x1xf32>
      %c0_86 = arith.constant 0 : index
      %c0_87 = arith.constant 0 : index
      %158 = vector.load %arg15[%c0_86, %c0_87] : memref<1x1xf32, #tpu.memory_space<vmem>>, vector<1x1xf32>
      %cst_88 = arith.constant 1.000000e+00 : f32
      %159 = vector.broadcast %cst_88 : f32 to vector<1x1xf32>
      %160 = arith.maximumf %158, %159 : vector<1x1xf32>
      %161 = tpu.reciprocal %160 : vector<1x1xf32> -> vector<1x1xf32>
      %cst_89 = arith.constant 5.000000e-01 : f32
      %162 = vector.broadcast %cst_89 : f32 to vector<1x1xf32>
      %163 = arith.mulf %162, %157 : vector<1x1xf32>
      %164 = arith.mulf %163, %161 : vector<1x1xf32>
      %c0_90 = arith.constant 0 : index
      %c0_91 = arith.constant 0 : index
      %165 = vector.load %arg6[%c0_90, %c0_91] : memref<1x1xf32, #tpu.memory_space<vmem>>, vector<1x1xf32>
      tpu.vector_store %arg6[%c0_90, %c0_91], %164 {strides = array<i32>} : memref<1x1xf32, #tpu.memory_space<vmem>>, vector<1x1xf32>,
    } else {
    }
    return
  }
  func.func @transform_0(%arg0: i32, %arg1: i32) -> (i32, i32) {
    %c0_i32 = arith.constant 0 : i32
    %c0_i32_0 = arith.constant 0 : i32
    %c0_i32_1 = arith.constant 0 : i32
    return %c0_i32, %c0_i32_0 : i32, i32
  }
  func.func @transform_1(%arg0: i32, %arg1: i32) -> (i32, i32) {
    %c0_i32 = arith.constant 0 : i32
    %c0_i32_0 = arith.constant 0 : i32
    return %arg0, %c0_i32 : i32, i32
  }
  func.func @transform_2(%arg0: i32, %arg1: i32) -> (i32, i32) {
    %c0_i32 = arith.constant 0 : i32
    %c0_i32_0 = arith.constant 0 : i32
    return %arg1, %c0_i32 : i32, i32
  }
  func.func @transform_3(%arg0: i32, %arg1: i32) -> (i32, i32) {
    %c0_i32 = arith.constant 0 : i32
    return %arg0, %arg1 : i32, i32
  }
  func.func @transform_4(%arg0: i32, %arg1: i32) -> (i32, i32) {
    %c0_i32 = arith.constant 0 : i32
    %c0_i32_0 = arith.constant 0 : i32
    %c0_i32_1 = arith.constant 0 : i32
    return %c0_i32, %c0_i32_0 : i32, i32
  }
}

</mosaic_0001>

<bundles_post_ra>
// kernel: tpu_custom_call.1
= control target key start
LH: loop header
LB: loop body
LE: loop exit
PB: predicated region body
PF: predicated region fallthrough
CT: control target
= control target key end

     0   :  { %10 = vsyncpa [#allocation13], 0  ;;  %s578_s0 = inlined_call_operand.<no memory space> [shape: f32[1,1], index: 0, kind: input, shape index: {}]   ;;  %s579_s1 = inlined_call_operand.hbm [shape: f32[8,128], index: 1, kind: input, shape index: {}]   ;;  %s580_s2 = inlined_call_operand.hbm [shape: f32[8,128], index: 2, kind: input, shape index: {}]   ;;  %s581_s3 = inlined_call_operand.vmem [shape: f32[8,8], index: 3, kind: input, shape index: {}]   ;;  %s582_s4 = inlined_call_operand.hbm [shape: f32[1,1], index: 4, kind: output, shape index: {}]  }
   0x1   :  { %11 = vsyncpa [#allocation16], 0 }
   0x2   :  { %12 = vsyncpa [#allocation14], 0  ;;  %s459_s15 = smov [#allocation12]   ;;  %s460_s17 = smov [#allocation15]  }
   0x3   :  { %s21_s16 = sshll.u32 %s459_s15, 4  ;;  %s31_s18 = sshll.u32 %s460_s17, 4  ;;  %s22_s16 = int_to_ptr.vmem [resolvable:$true] %s21_s16  ;;  %s32_s18 = int_to_ptr.vmem [resolvable:$true] %s31_s18 }
   0x4   :  { %s387_s21 = scalar_lea.hbm %s579_s1, 128 }
   0x5   :  { %p388_p0 = scmp.ne.s32.totalorder %s579_s1, %s387_s21  ;;  %p391_p1 = scmp.lt.u32.totalorder %s387_s21, %s579_s1 }
   0x7   :  { %p393_p2 = pnand %p391_p1, %p388_p0 }
   0x9   :  { %396 = shalt.err (!%p393_p2)
}
   0xa   :  { %s397_s26 = scalar_lea.vmem %s22_s16, 128  ;;  %p402_p4 = scmp.lt.s32.totalorder %s22_s16, %s22_s16 }
   0xb   :  { %p398_p3 = scmp.ne.s32.totalorder %s22_s16, %s397_s26  ;;  %p403_p5 = scmp.lt.s32.totalorder %s397_s26, %s397_s26 }
   0xd   :  { %p404_p6 = por %p403_p5, %p402_p4 }
   0xf   :  { %p405_p7 = pnand %p404_p6, %p398_p3 }
  0x11   :  { %408 = shalt.err (!%p405_p7)
}
  0x12   :  { %24 = dma.hbm_to_vmem [thread:$0]  %s579_s1, 128, %s22_s16, [#allocation13]  }
  0x13   :  { %s409_s5 = scalar_lea.hbm %s580_s2, 128 }
  0x14   :  { %p410_p8 = scmp.ne.s32.totalorder %s580_s2, %s409_s5  ;;  %p413_p9 = scmp.lt.u32.totalorder %s409_s5, %s580_s2 }
  0x16   :  { %p415_p10 = pnand %p413_p9, %p410_p8 }
  0x18   :  { %418 = shalt.err (!%p415_p10)
}
  0x19   :  { %s419_s10 = scalar_lea.vmem %s32_s18, 128  ;;  %p424_p12 = scmp.lt.s32.totalorder %s32_s18, %s32_s18 }
  0x1a   :  { %p420_p11 = scmp.ne.s32.totalorder %s32_s18, %s419_s10  ;;  %p425_p13 = scmp.lt.s32.totalorder %s419_s10, %s419_s10 }
  0x1c   :  { %p426_p0 = por %p425_p13, %p424_p12 }
  0x1e   :  { %p427_p1 = pnand %p426_p0, %p420_p11 }
  0x20   :  { %430 = shalt.err (!%p427_p1)
}
  0x21   :  { %34 = dma.hbm_to_vmem [thread:$0]  %s580_s2, 128, %s32_s18, [#allocation16]  }
  0x22   :  { %453 = dma.done.wait [#allocation13], 128  }
  0x23   :  { %454 = vsyncadd [#allocation13], 4294967168 }
  0x24   :  { %455 = dma.done.wait [#allocation16], 128  }
  0x25   :  { %456 = vsyncadd [#allocation16], 4294967168  ;;  %v68_v0 = vld [vmem:[#allocation15] sm:$0xff]  ;;  %v67_v1 = vld [vmem:[#allocation12] sm:$0xff]  ;;  %v461_v4 = vmov 0.0   ;;  %vm462_vm0 = vmmov 0   ;;  %v82_v5 = vstv %s578_s0 }
  0x26   :  { %v75_v2 = vmul.f32 %v68_v0, %v68_v0  ;;  %v69_v3 = vmul.f32 %v67_v1, %v67_v1  ;;  %340 = vmatprep.subr.mxu0 %v461_v4  ;;  %342 = vmatprep.mubr.msk.f32.mxu0 %vm462_vm0, %v461_v4  ;;  %v83_v6 = vmul.f32 1.442695, %v82_v5  ;;  %v158_v16 = vld [vmem:[%s581_s3] sm:$0xff]  ;;  %vm164_vm2 = vcmask 64512   ;;  %s464_s19 = smov [#allocation17]  }
  0x27   :  { %vm159_vm1 = vcmp.eq.f32.partialorder %v158_v16, 1.0  ;;  %vm56_vm3 = vcmask 57344   ;;  %vm63_vm4 = vcmask 7168   ;;  %v463_v22 = vmov -inf   ;;  %s327_s20 = sshll.u32 %s464_s19, 4  ;;  %s328_s20 = int_to_ptr.vmem [resolvable:$true] %s327_s20 }
  0x28   :  { %76 = vadd.xlane.f32.xlu0 %v75_v2  ;;  %363 = vpow2.f32 %v83_v6  ;;  %v337_v17 = vsel %vm159_vm1, 1.0, %v461_v4  ;;  %59 = vst.msk [vmem:[#allocation7] sm:$0x1] %vm56_vm3, %v461_v4  ;;  %58 = vst.msk [vmem:[#allocation6] sm:$0x1] %vm56_vm3, %v461_v4  ;;  %vm49_vm5 = vcmask 0   ;;  %p436_p3 = scmp.lt.s32.totalorder %s328_s20, %s328_s20 }
  0x29   :  { %v180_v18 = vsel %vm164_vm2, %v337_v17, 0.0  ;;  %64 = vst.msk [vmem:[#allocation2] sm:$0xff] %vm63_vm4, %v463_v22  ;;  %65 = vst.msk [vmem:[#allocation3] sm:$0xff] %vm63_vm4, %v461_v4  ;;  %s431_s21 = scalar_lea.vmem %s328_s20, 16  ;;  %s435_s22 = scalar_lea.vmem %s328_s20, 32 }
  0x2a   :  { %v198_v19 = vrot.slane %v180_v18, 4  ;;  %57 = vst.msk [vmem:[#allocation5] sm:$0x1] %vm56_vm3, %v463_v22  ;;  %p432_p2 = scmp.ne.s32.totalorder %s328_s20, %s431_s21  ;;  %p437_p4 = scmp.lt.s32.totalorder %s435_s22, %s431_s21 }
  0x2b   :  { %66 = vst.msk [vmem:[#allocation4] sm:$0xff] %vm63_vm4, %v461_v4 }
  0x2c   :  { %70 = vadd.xlane.f32.xlu0 %v69_v3  ;;  %v199_v20 = vadd.f32 %v198_v19, %v180_v18  ;;  %51 = vst.msk [vmem:[#allocation9] sm:$0x1] %vm49_vm5, %v461_v4  ;;  %50 = vst.msk [vmem:[#allocation8] sm:$0x1] %vm49_vm5, %v461_v4  ;;  %p438_p5 = por %p437_p4, %p436_p3 }
  0x2d   :  { %52 = vst.msk [vmem:[#allocation10] sm:$0x1] %vm49_vm5, %v461_v4 }
  0x2e   :  { %v200_v21 = vrot.slane %v199_v20, 2  ;;  %p439_p6 = pnand %p438_p5, %p432_p2 }
  0x2f   :  { %v197_v25 = vld [vmem:[#allocation7] sm:$0x1] }
  0x30   :  { %181 = vadd.xlane.f32.xlu0 %v180_v18  ;;  %v201_v23 = vadd.f32 %v200_v21, %v199_v20  ;;  %v534_v39 = vld [vmem:[#allocation2] sm:$0xff] }
  0x31   :  { %v249_v4 = vld [vmem:[#allocation5] sm:$0x1] }
  0x32   :  { %v364_v7 = vpop.eup %363  ;;  %v202_v24 = vrot.slane %v201_v23, 1  ;;  %v193_v36 = vld [vmem:[#allocation4] sm:$0xff] }
  0x33   :  { %345 = vpush %v364_v7 }
  0x34   :  { %v203_v26 = vadd.f32 %v202_v24, %v201_v23  ;;  %v179_v2 = vld [vmem:[#allocation10] sm:$0x1] }
  0x36   :  { %v204_v27 = vadd.f32 %v203_v26, %v197_v25  ;;  %v251_v25 = vld [vmem:[#allocation6] sm:$0x1] }
  0x38   :  { %206 = vst.msk [vmem:[#allocation7] sm:$0x1] %vm56_vm3, %v204_v27 }
  0x64   :  { %s346_s0 = spop %345 }
  0x65   :  { %v156_v28 = vstv %s346_s0 }
  0xb5   :  { %v77_v8 = vpop.xlane.xlu0 %76 }
  0xb6   :  { %v78_v9 = vmax.f32 %v77_v8, 1e-24 }
  0xb8   :  { %365 = vrsqrt.f32 %v78_v9 }
  0xb9   :  { %v71_v10 = vpop.xlane.xlu0 %70 }
  0xba   :  { %v72_v11 = vmax.f32 %v71_v10, 1e-24 }
  0xbc   :  { %367 = vrsqrt.f32 %v72_v11 }
  0xbd   :  { %v182_v35 = vpop.xlane.xlu0 %181 }
  0xbe   :  { %v194_v37 = vadd.f32 %v193_v36, %v182_v35  ;;  %v183_v38 = vrot.slane %v182_v35, 4 }
  0xc0   :  { %196 = vst.msk [vmem:[#allocation4] sm:$0xff] %vm63_vm4, %v194_v37  ;;  %v184_v40 = vadd.f32 %v183_v38, %v182_v35  ;;  %v295_v35 = vld [vmem:[#allocation7] sm:$0x1] }
  0xc1   :  { %vm296_vm6 = vcmp.gt.f32.partialorder %v295_v35, 0.0 }
  0xc2   :  { %v366_v12 = vpop.eup %365  ;;  %v185_v45 = vrot.slane %v184_v40, 2 }
  0xc3   :  { %v80_v13 = vmul.f32 %v366_v12, %v68_v0 }
  0xc4   :  { %v186_v52 = vadd.f32 %v185_v45, %v184_v40 }
  0xc5   :  { %341 = vmatpush3.xpose.msra.mxu0 %v80_v13 }
  0xc6   :  { %v368_v14 = vpop.eup %367  ;;  %v187_v56 = vrot.slane %v186_v52, 1 }
  0xc7   :  { %v74_v15 = vmul.f32 %v368_v14, %v67_v1  ;;  %v162_v1 = vld [vmem:[#allocation9] sm:$0x1] }
  0xc8   :  { %v188_v60 = vadd.f32 %v187_v56, %v186_v52 }
  0xc9   :  { %343 = vmatmul.mubr.f32.vlgmr.msra.gmra.mrb[0].mxu0 %v74_v15 }
 0x19c   :  { %v152_v29 = vpop.f32.mrb[0].mxu0 }
 0x19d   :  { %v157_v30 = vmul.f32 %v156_v28, %v152_v29  ;;  %v344_v31 = vpop.f32.mrb[1].mxu0 }
 0x19f   :  { %v207_v32 = vsel %vm164_vm2, %v157_v30, -inf  ;;  %v163_v33 = vmul.f32 %v337_v17, %v157_v30 }
 0x1a0   :  { %208 = vmax.xlane.f32.xlu1 %v207_v32 }
 0x1a1   :  { %v165_v34 = vsel %vm164_vm2, %v163_v33, 0.0 }
 0x1a4   :  { %166 = vadd.xlane.f32.xlu1 %v165_v34 }
 0x22d   :  { %v536_v41 = vpop.xlane.xlu1 %208 }
 0x22e   :  { %v217_v42 = vsub.f32 %v157_v30, %v536_v41  ;;  %v541_v43 = vmax.f32 %v534_v39, %v536_v41  ;;  %v210_v44 = vrot.slane %v536_v41, 4 }
 0x230   :  { %v223_v46 = vsub.f32 %v534_v39, %v541_v43  ;;  %236 = vst.msk [vmem:[#allocation2] sm:$0xff] %vm63_vm4, %v541_v43  ;;  %v218_v47 = vmul.f32 1.442695, %v217_v42  ;;  %v211_v48 = vmax.f32 %v536_v41, %v210_v44  ;;  %v230_v44 = vsub.f32 %v536_v41, %v541_v43  ;;  %v272_v39 = vld [vmem:[#allocation4] sm:$0xff] }
 0x231   :  { %v167_v49 = vpop.xlane.xlu1 %166 }
 0x232   :  { %v168_v50 = vrot.slane %v167_v49, 4  ;;  %369 = vpow2.f32 %v218_v47  ;;  %v212_v51 = vrot.slane %v211_v48, 2  ;;  %v224_v45 = vmul.f32 1.442695, %v223_v46 }
 0x233   :  { %v231_v47 = vmul.f32 1.442695, %v230_v44 }
 0x234   :  { %v169_v53 = vadd.f32 %v168_v50, %v167_v49  ;;  %v213_v55 = vmax.f32 %v211_v48, %v212_v51  ;;  %v222_v49 = vld [vmem:[#allocation3] sm:$0xff] }
 0x236   :  { %v170_v54 = vrot.slane %v169_v53, 2  ;;  %v214_v59 = vrot.slane %v213_v55, 1 }
 0x238   :  { %v171_v57 = vadd.f32 %v170_v54, %v169_v53  ;;  %v215_v0 = vmax.f32 %v213_v55, %v214_v59 }
 0x23a   :  { %v172_v58 = vrot.slane %v171_v57, 1 }
 0x23c   :  { %v370_v61 = vpop.eup %369  ;;  %v173_v62 = vadd.f32 %v172_v58, %v171_v57  ;;  %v266_v57 = vld [vmem:[#allocation2] sm:$0xff] }
 0x23d   :  { %v227_v63 = vsel %vm164_vm2, %v370_v61, 0.0 }
 0x23e   :  { %228 = vadd.xlane.f32.xlu1 %v227_v63  ;;  %347 = vpush %v173_v62 }
 0x23f   :  { %349 = vpush %v188_v60 }
 0x240   :  { %351 = vpush %v215_v0 }
 0x26f   :  { %s348_s3 = spop %347 }
 0x270   :  { %v175_v3 = vstv %s348_s3  ;;  %s350_s15 = spop %349 }
 0x271   :  { %v176_v5 = vadd.f32 %v175_v3, %v162_v1  ;;  %v190_v6 = vstv %s350_s15  ;;  %s352_s16 = spop %351 }
 0x272   :  { %v191_v7 = vadd.f32 %v190_v6, %v179_v2  ;;  %v237_v8 = vstv %s352_s16 }
 0x273   :  { %178 = vst.msk [vmem:[#allocation9] sm:$0x1] %vm49_vm5, %v176_v5  ;;  %v238_v9 = vsub.f32 %v536_v41, %v237_v8  ;;  %v250_v10 = vmax.f32 %v249_v4, %v237_v8 }
 0x274   :  { %192 = vst.msk [vmem:[#allocation10] sm:$0x1] %vm49_vm5, %v191_v7 }
 0x275   :  { %v239_v11 = vmul.f32 1.442695, %v238_v9  ;;  %262 = vst.msk [vmem:[#allocation5] sm:$0x1] %vm56_vm3, %v250_v10  ;;  %v252_v12 = vsub.f32 %v249_v4, %v250_v10  ;;  %v256_v13 = vsub.f32 %v237_v8, %v250_v10  ;;  %v271_v9 = vld [vmem:[#allocation8] sm:$0x1] }
 0x277   :  { %371 = vpow2.f32 %v239_v11  ;;  %v253_v14 = vmul.f32 1.442695, %v252_v12  ;;  %v257_v17 = vmul.f32 1.442695, %v256_v13 }
 0x279   :  { %373 = vpow2.f32 %v253_v14 }
 0x27a   :  { %375 = vpow2.f32 %v257_v17  ;;  %v312_v14 = vld [vmem:[#allocation9] sm:$0x1] }
 0x27b   :  { %v315_v10 = vld [vmem:[#allocation10] sm:$0x1] }
 0x27c   :  { %v289_v36 = vld [vmem:[#allocation5] sm:$0x1]  ;;  %v316_v13 = vmax.f32 %v315_v10, 1.0 }
 0x281   :  { %v372_v15 = vpop.eup %371 }
 0x282   :  { %v241_v16 = vmul.f32 %v372_v15, %v370_v61 }
 0x283   :  { %v374_v24 = vpop.eup %373 }
 0x284   :  { %v242_v18 = vsel %vm164_vm2, %v241_v16, 0.0  ;;  %v376_v27 = vpop.eup %375  ;;  %v255_v28 = vmul.f32 %v374_v24, %v251_v25 }
 0x285   :  { %v243_v19 = vrot.slane %v242_v18, 4 }
 0x287   :  { %v244_v20 = vadd.f32 %v243_v19, %v242_v18  ;;  %v313_v18 = vmul.f32 2.0, %v312_v14 }
 0x289   :  { %v245_v21 = vrot.slane %v244_v20, 2 }
 0x28b   :  { %v246_v22 = vadd.f32 %v245_v21, %v244_v20 }
 0x28d   :  { %v247_v23 = vrot.slane %v246_v22, 1 }
 0x28f   :  { %v248_v26 = vadd.f32 %v247_v23, %v246_v22 }
 0x291   :  { %v259_v29 = vmul.f32 %v376_v27, %v248_v26 }
 0x293   :  { %v260_v30 = vadd.f32 %v259_v29, %v255_v28 }
 0x295   :  { %261 = vst.msk [vmem:[#allocation6] sm:$0x1] %vm56_vm3, %v260_v30 }
 0x29c   :  { %v290_v31 = vld [vmem:[#allocation6] sm:$0x1] }
 0x29d   :  { %v291_v32 = vmax.f32 %v290_v31, 1e-30 }
 0x29f   :  { %377 = vlog2.f32 %v291_v32 }
 0x2a0   :  { %379 = vpow2.f32 %v224_v45 }
 0x2a1   :  { %381 = vpow2.f32 %v231_v47 }
 0x2a9   :  { %v378_v33 = vpop.eup %377 }
 0x2aa   :  { %v293_v34 = vmul.f32 0.6931472, %v378_v33  ;;  %v380_v48 = vpop.eup %379 }
 0x2ab   :  { %v382_v50 = vpop.eup %381  ;;  %v226_v52 = vmul.f32 %v380_v48, %v222_v49 }
 0x2ac   :  { %v294_v37 = vadd.f32 %v293_v34, %v289_v36 }
 0x2ae   :  { %v297_v38 = vmul.f32 %v295_v35, %v294_v37 }
 0x2b0   :  { %v298_v40 = vsel %vm296_vm6, %v297_v38, 0.0 }
 0x2b1   :  { %v299_v42 = vsel %vm56_vm3, %v298_v40, 0.0 }
 0x2b2   :  { %300 = vadd.xlane.f32.xlu1 %v299_v42 }
 0x2cb   :  { %v229_v51 = vpop.xlane.xlu1 %228 }
 0x2cc   :  { %v233_v53 = vmul.f32 %v382_v50, %v229_v51 }
 0x2ce   :  { %v234_v54 = vadd.f32 %v233_v53, %v226_v52 }
 0x2d0   :  { %235 = vst.msk [vmem:[#allocation3] sm:$0xff] %vm63_vm4, %v234_v54 }
 0x2d7   :  { %v267_v55 = vld [vmem:[#allocation3] sm:$0xff] }
 0x2d8   :  { %383 = vlog2.f32 %v267_v55 }
 0x2d9   :  { %385 = vrcp.f32 %v316_v13 }
 0x2e2   :  { %v384_v56 = vpop.eup %383 }
 0x2e3   :  { %v269_v41 = vmul.f32 0.6931472, %v384_v56  ;;  %v386_v21 = vpop.eup %385 }
 0x2e5   :  { %v270_v58 = vadd.f32 %v269_v41, %v266_v57 }
 0x2e7   :  { %v273_v43 = vmul.f32 %v272_v39, %v270_v58 }
 0x2e9   :  { %v274_v46 = vsel %vm63_vm4, %v273_v43, 0.0 }
 0x2ea   :  { %275 = vadd.xlane.f32.xlu0 %v274_v46 }
 0x33f   :  { %v301_v59 = vpop.xlane.xlu1 %300 }
 0x340   :  { %v302_v60 = vrot.slane %v301_v59, 4 }
 0x342   :  { %v303_v61 = vadd.f32 %v302_v60, %v301_v59 }
 0x344   :  { %v304_v62 = vrot.slane %v303_v61, 2 }
 0x346   :  { %v305_v2 = vadd.f32 %v304_v62, %v303_v61 }
 0x348   :  { %v306_v5 = vrot.slane %v305_v2, 1 }
 0x34a   :  { %v307_v8 = vadd.f32 %v306_v5, %v305_v2 }
 0x377   :  { %v276_v63 = vpop.xlane.xlu0 %275 }
 0x378   :  { %v277_v0 = vrot.slane %v276_v63, 4 }
 0x37a   :  { %v278_v1 = vadd.f32 %v277_v0, %v276_v63 }
 0x37c   :  { %v279_v3 = vrot.slane %v278_v1, 2 }
 0x37e   :  { %v280_v4 = vadd.f32 %v279_v3, %v278_v1 }
 0x380   :  { %v281_v6 = vrot.slane %v280_v4, 1 }
 0x382   :  { %v282_v7 = vadd.f32 %v281_v6, %v280_v4 }
 0x384   :  { %353 = vpush %v282_v7 }
 0x385   :  { %355 = vpush %v307_v8 }
 0x3b5   :  { %s354_s17 = spop %353 }
 0x3b6   :  { %v284_v11 = vstv %s354_s17  ;;  %s356_s18 = spop %355 }
 0x3b7   :  { %v285_v12 = vadd.f32 %v284_v11, %v271_v9  ;;  %v310_v16 = vstv %s356_s18 }
 0x3b9   :  { %286 = vst.msk [vmem:[#allocation8] sm:$0x1] %vm49_vm5, %v285_v12 }
 0x3c0   :  { %v309_v15 = vld [vmem:[#allocation8] sm:$0x1] }
 0x3c1   :  { %v311_v17 = vadd.f32 %v310_v16, %v309_v15 }
 0x3c3   :  { %v314_v19 = vsub.f32 %v311_v17, %v313_v18 }
 0x3c5   :  { %v318_v20 = vmul.f32 0.5, %v314_v19 }
 0x3c7   :  { %v319_v22 = vmul.f32 %v386_v21, %v318_v20 }
 0x3c9   :  { %320 = vst.msk [vmem:[#allocation17] sm:$0x1] %vm49_vm5, %v319_v22 }
 0x3ca   :  { %442 = shalt.err (!%p439_p6)
}
 0x3cb   :  { %s443_s25 = scalar_lea.hbm %s582_s4, 16 }
 0x3cc   :  { %p444_p7 = scmp.ne.s32.totalorder %s582_s4, %s443_s25  ;;  %p447_p8 = scmp.lt.u32.totalorder %s443_s25, %s582_s4 }
 0x3ce   :  { %p449_p9 = pnand %p447_p8, %p444_p7 }
 0x3d0   :  { %452 = shalt.err (!%p449_p9)
}
 0x3d1   :  { %330 = dma.vmem_to_hbm [thread:$0]  %s328_s20, 16, %s582_s4, [#allocation14]  }
 0x3d2   :  { %457 = dma.done.wait [#allocation14], 16  }
 0x3d3   :  { %458 = vsyncadd [#allocation14], 4294967280 }
 0x3d4   :  { %334 = vsyncpa [#allocation13], 1 }
 0x3d5   :  { %335 = vsyncpa [#allocation16], 1 }
 0x3d6   :  { %336 = vsyncpa [#allocation14], 1 }

</bundles_post_ra>
